<compile_context>
chip_gen: v7x
topology: tpu7x:2x2x1
jax: 0.10.0
libtpu: 0.0.40
codegen_flags: <defaults>
</compile_context>

<pallas_src>
import functools
import math

import jax
import jax.numpy as jnp
from jax.experimental import pallas as pl
from jax.experimental.pallas import tpu as pltpu

_LANE = 128
_SUBLANE = 8


def _round_up(v, m):
    return (v + m - 1) // m * m


def _packing_factor(hidden):
    """How many logical rows get packed into one 128-lane packed row."""
    if hidden < _LANE and _LANE % hidden == 0:
        return _LANE // hidden
    return 1


def _swish(x):
    # x * sigmoid(x); exp and approx reciprocal both ride the EUP slot.
    return x * pl.reciprocal(1.0 + jnp.exp(-x), approx=True)


def _elu(x):
    # ELU(alpha=1); exp(min(x,0)) avoids overflow for large positive x.
    return jnp.where(x > 0, x, jnp.exp(jnp.minimum(x, 0.0)) - 1.0)


def _line_model_kernel(x_ref, wmlp_ref, bmlp_ref,
                       w1_ref, b1_ref, w2_ref, b2_ref, we_ref, be_ref,
                       wf_ref, bf_ref, o_ref, *, num_blocks: int):
    """One grid step = one tile of packed rows; whole network fused.

    x_ref:   (TBP, P*Din)  bf16   packed row tile of the input
    wmlp:    (P*Din, Wpk)  bf16,  bmlp (1, Wpk) f32
    w1/w2/we:(NB, Wpk, Wpk) bf16, b1/b2/be (NB, 1, Wpk) f32  (block-diag packed)
    wf:      (Wpk, P*Dout) bf16,  bf (1, P*Dout) f32
    o_ref:   (TBP, P*Dout) f32    packed output tile (no lane padding)
    """
    f32 = jnp.float32
    bf16 = jnp.bfloat16

    # mlp + ELU
    h = jnp.dot(x_ref[...], wmlp_ref[...], preferred_element_type=f32) + bmlp_ref[...]
    h = _elu(h)

    # ResLine blocks (static unroll; num_blocks is small and compile-time)
    for nb in range(num_blocks):
        r = h
        o = jnp.dot(h.astype(bf16), w1_ref[nb], preferred_element_type=f32) + b1_ref[nb]
        o = _swish(o)
        o = jnp.dot(o.astype(bf16), w2_ref[nb], preferred_element_type=f32) + b2_ref[nb]
        o = _swish(o)
        o = jnp.dot(o.astype(bf16), we_ref[nb], preferred_element_type=f32) + be_ref[nb]
        o = _swish(o)
        h = o + 0.5 * r

    # final linear, stored in packed layout (no 128-lane padding of the output)
    out = jnp.dot(h.astype(bf16), wf_ref[...], preferred_element_type=f32) + bf_ref[...]
    o_ref[...] = out.astype(o_ref.dtype)


def line_model_forward(x, params, *, tile_rows: int = 1024):
    """Pallas forward pass matching PyTorch LineModel.forward.

    params = {
      "mlp":    (W (hidden, in),  b (hidden,)),
      "blocks": [ {"fc1": (W, b), "fc2": (W, b), "extra": (W, b)}, ... ],
      "final":  (W (out, hidden), b (out,)),
    }  (PyTorch nn.Linear convention: y = x @ W.T + b)
    """
    b, din = x.shape
    w_mlp, b_mlp = params["mlp"]
    w_fin, b_fin = params["final"]
    blocks = params["blocks"]
    num_blocks = len(blocks)
    hidden = w_mlp.shape[0]
    out_dim = w_fin.shape[0]

    f32, bf16 = jnp.float32, jnp.bfloat16
    P = _packing_factor(hidden)              # rows packed per 128-lane group
    wpk = _round_up(P * hidden, _LANE)       # packed hidden width (lane dense)
    dpk = P * din                            # packed input width
    opk = P * out_dim                        # packed output width

    def pack_linear(w, bvec, rows_total, cols_total):
        # PyTorch (out, in) -> (in, out), then P block-diagonal copies, zero pad.
        wt = jnp.transpose(w).astype(f32)
        r, c = wt.shape
        wb = jnp.zeros((rows_total, cols_total), f32)
        bb = jnp.zeros((cols_total,), f32)
        for p in range(P):
            wb = wb.at[p * r:(p + 1) * r, p * c:(p + 1) * c].set(wt)
            bb = bb.at[p * c:(p + 1) * c].set(bvec.astype(f32))
        return wb.astype(bf16), bb.reshape(1, cols_total)

    wmlp, bmlp = pack_linear(w_mlp, b_mlp, dpk, wpk)
    wf, bf = pack_linear(w_fin, b_fin, wpk, opk)

    w1s, b1s, w2s, b2s, wes, bes = [], [], [], [], [], []
    for blk in blocks:
        w1, b1 = pack_linear(*blk["fc1"], wpk, wpk)
        w2, b2 = pack_linear(*blk["fc2"], wpk, wpk)
        we, be = pack_linear(*blk["extra"], wpk, wpk)
        w1s.append(w1); b1s.append(b1)
        w2s.append(w2); b2s.append(b2)
        wes.append(we); bes.append(be)
    w1 = jnp.stack(w1s); b1 = jnp.stack(b1s)
    w2 = jnp.stack(w2s); b2 = jnp.stack(b2s)
    we = jnp.stack(wes); be = jnp.stack(bes)

    # Row tiling: tb logical rows per grid step (tb/P packed rows, mult. of 8).
    row_align = _SUBLANE * P
    tb = min(tile_rows, _round_up(b, row_align))
    tb = _round_up(tb, row_align)
    bp = _round_up(b, tb)
    if bp // tb == 1 and tb >= 2 * row_align:
        # Keep >= 2 parallel grid steps when possible (v7x megacore).
        tb = _round_up(tb // 2, row_align)
        bp = _round_up(b, tb)
    n_tiles = bp // tb
    tbp = tb // P                            # packed rows per tile

    # Pack input: (bp, din) -> (bp/P, P*din) is a contiguous (free) reshape.
    xp = jnp.pad(x.astype(f32), ((0, bp - b), (0, 0)))
    xpk = xp.reshape(bp // P, dpk).astype(bf16)

    kernel = functools.partial(_line_model_kernel, num_blocks=num_blocks)

    out_pk = pl.pallas_call(
        kernel,
        out_shape=jax.ShapeDtypeStruct((bp // P, opk), f32),
        grid_spec=pltpu.PrefetchScalarGridSpec(
            num_scalar_prefetch=0,
            grid=(n_tiles,),
            in_specs=[
                pl.BlockSpec((tbp, dpk), lambda i: (i, 0)),
                # weights/biases: constant index_map -> VMEM-resident, not re-DMA'd
                pl.BlockSpec((dpk, wpk), lambda i: (0, 0)),
                pl.BlockSpec((1, wpk), lambda i: (0, 0)),
                pl.BlockSpec((num_blocks, wpk, wpk), lambda i: (0, 0, 0)),
                pl.BlockSpec((num_blocks, 1, wpk), lambda i: (0, 0, 0)),
                pl.BlockSpec((num_blocks, wpk, wpk), lambda i: (0, 0, 0)),
                pl.BlockSpec((num_blocks, 1, wpk), lambda i: (0, 0, 0)),
                pl.BlockSpec((num_blocks, wpk, wpk), lambda i: (0, 0, 0)),
                pl.BlockSpec((num_blocks, 1, wpk), lambda i: (0, 0, 0)),
                pl.BlockSpec((wpk, opk), lambda i: (0, 0)),
                pl.BlockSpec((1, opk), lambda i: (0, 0)),
            ],
            out_specs=pl.BlockSpec((tbp, opk), lambda i: (i, 0)),
        ),
        compiler_params=pltpu.CompilerParams(
            dimension_semantics=("parallel",),
            vmem_limit_bytes=32 * 1024 * 1024),
    )(xpk, wmlp, bmlp, w1, b1, w2, b2, we, be, wf, bf)

    # Unpack: (bp/P, P*out_dim) -> (bp, out_dim), slice off row padding.
    return out_pk.reshape(bp, out_dim)[:b]


def _reference_forward(x, params, matmul_dtype=jnp.float32):
    """Pure-JAX reference (PyTorch semantics); matmul operands in matmul_dtype."""
    f32 = jnp.float32

    def lin(w, bvec, h):
        return (jnp.dot(h.astype(matmul_dtype), jnp.transpose(w).astype(matmul_dtype),
                        preferred_element_type=f32)
                + bvec.astype(f32))

    w_mlp, b_mlp = params["mlp"]
    h = lin(w_mlp, b_mlp, x.astype(f32))
    h = jnp.where(h > 0, h, jnp.exp(jnp.minimum(h, 0.0)) - 1.0)   # ELU
    for blk in params["blocks"]:
        r = h
        o = lin(*blk["fc1"], h);   o = o * jax.nn.sigmoid(o)
        o = lin(*blk["fc2"], o);   o = o * jax.nn.sigmoid(o)
        o = lin(*blk["extra"], o); o = o * jax.nn.sigmoid(o)
        h = o + 0.5 * r
    w_fin, b_fin = params["final"]
    return lin(w_fin, b_fin, h)


if __name__ == "__main__":
    key = jax.random.PRNGKey(0)
    B, DIN, HID, DOUT, NBLK = 256, 8, 32, 4, 2

    ks = iter(jax.random.split(key, 32))

    def kaiming(k, out_f, in_f):
        return jax.random.normal(k, (out_f, in_f), jnp.float32) * math.sqrt(2.0 / in_f)

    x = jax.random.normal(next(ks), (B, DIN), jnp.float32)

    params = {
        "mlp": (kaiming(next(ks), HID, DIN),
                0.1 * jax.random.normal(next(ks), (HID,), jnp.float32)),
        "blocks": [
            {"fc1": (kaiming(next(ks), HID, HID),
                     0.1 * jax.random.normal(next(ks), (HID,), jnp.float32)),
             "fc2": (kaiming(next(ks), HID, HID),
                     0.1 * jax.random.normal(next(ks), (HID,), jnp.float32)),
             "extra": (kaiming(next(ks), HID, HID),
                       0.1 * jax.random.normal(next(ks), (HID,), jnp.float32))}
            for _ in range(NBLK)
        ],
        "final": (kaiming(next(ks), DOUT, HID),
                  0.1 * jax.random.normal(next(ks), (DOUT,), jnp.float32)),
    }

    out = jax.block_until_ready(line_model_forward(x, params))
    assert out.shape == (B, DOUT)

    ref_bf16 = jax.block_until_ready(_reference_forward(x, params, jnp.bfloat16))
    ref_f32 = jax.block_until_ready(_reference_forward(x, params, jnp.float32))

    scale = float(jnp.max(jnp.abs(ref_f32))) + 1.0
    err_bf = float(jnp.max(jnp.abs(out - ref_bf16)))
    err_f32 = float(jnp.max(jnp.abs(out - ref_f32)))

    # vs bf16-operand reference: only approx-reciprocal / accumulation order differ
    assert err_bf < 2e-2 * scale, f"mismatch vs bf16 reference: {err_bf} (scale {scale})"
    # vs full-f32 reference: bf16 matmul operands + approx sigmoid error envelope
    assert err_f32 < 4e-2 * scale, f"mismatch vs f32 reference: {err_f32} (scale {scale})"

    print("KERNEL_OK")
</pallas_src>

<mosaic_0001>
module attributes {stable_mosaic.version = 11 : i64} {
  func.func @_line_model_kernel(%arg0: i32, %arg1: memref<32x32xbf16, #tpu.memory_space<vmem>>, %arg2: memref<32x128xbf16, #tpu.memory_space<vmem>>, %arg3: memref<1x128xf32, #tpu.memory_space<vmem>>, %arg4: memref<2x128x128xbf16, #tpu.memory_space<vmem>>, %arg5: memref<2x1x128xf32, #tpu.memory_space<vmem>>, %arg6: memref<2x128x128xbf16, #tpu.memory_space<vmem>>, %arg7: memref<2x1x128xf32, #tpu.memory_space<vmem>>, %arg8: memref<2x128x128xbf16, #tpu.memory_space<vmem>>, %arg9: memref<2x1x128xf32, #tpu.memory_space<vmem>>, %arg10: memref<128x16xbf16, #tpu.memory_space<vmem>>, %arg11: memref<1x16xf32, #tpu.memory_space<vmem>>, %arg12: memref<32x16xf32, #tpu.memory_space<vmem>>) attributes {dimension_semantics = [#tpu.dimension_semantics<parallel>], iteration_bounds = array<i64: 2>, scalar_prefetch = 0 : i64, scratch_operands = 0 : i64, tpu.core_type = #tpu.core_type<tc>, window_params = [{transform_indices = @transform_0, window_bounds = array<i64: 32, 32>}, {pipeline_mode = #tpu.pipeline_mode<synchronous>, transform_indices = @transform_1, window_bounds = array<i64: 32, 128>}, {pipeline_mode = #tpu.pipeline_mode<synchronous>, transform_indices = @transform_2, window_bounds = array<i64: 1, 128>}, {pipeline_mode = #tpu.pipeline_mode<synchronous>, transform_indices = @transform_3, window_bounds = array<i64: 2, 128, 128>}, {pipeline_mode = #tpu.pipeline_mode<synchronous>, transform_indices = @transform_4, window_bounds = array<i64: 2, 1, 128>}, {pipeline_mode = #tpu.pipeline_mode<synchronous>, transform_indices = @transform_5, window_bounds = array<i64: 2, 128, 128>}, {pipeline_mode = #tpu.pipeline_mode<synchronous>, transform_indices = @transform_6, window_bounds = array<i64: 2, 1, 128>}, {pipeline_mode = #tpu.pipeline_mode<synchronous>, transform_indices = @transform_7, window_bounds = array<i64: 2, 128, 128>}, {pipeline_mode = #tpu.pipeline_mode<synchronous>, transform_indices = @transform_8, window_bounds = array<i64: 2, 1, 128>}, {pipeline_mode = #tpu.pipeline_mode<synchronous>, transform_indices = @transform_9, window_bounds = array<i64: 128, 16>}, {pipeline_mode = #tpu.pipeline_mode<synchronous>, transform_indices = @transform_10, window_bounds = array<i64: 1, 16>}, {transform_indices = @transform_11, window_bounds = array<i64: 32, 16>}]} {
    %c0 = arith.constant 0 : index
    %c0_0 = arith.constant 0 : index
    %0 = vector.load %arg1[%c0, %c0_0] : memref<32x32xbf16, #tpu.memory_space<vmem>>, vector<32x32xbf16>
    %c0_1 = arith.constant 0 : index
    %c0_2 = arith.constant 0 : index
    %1 = vector.load %arg2[%c0_1, %c0_2] : memref<32x128xbf16, #tpu.memory_space<vmem>>, vector<32x128xbf16>
    %cst = arith.constant dense<0.000000e+00> : vector<32x128xf32>
    %2 = tpu.matmul %0, %1, %cst {dimension_numbers = #tpu.dot_dimension_numbers<[1], [0], [0], [1], [0, 0, 1, 1], [], []>} : vector<32x32xbf16>, vector<32x128xbf16>, vector<32x128xf32> -> vector<32x128xf32>
    %c0_3 = arith.constant 0 : index
    %c0_4 = arith.constant 0 : index
    %3 = vector.load %arg3[%c0_3, %c0_4] : memref<1x128xf32, #tpu.memory_space<vmem>>, vector<1x128xf32>
    %4 = vector.broadcast %3 : vector<1x128xf32> to vector<32x128xf32>
    %5 = arith.addf %2, %4 : vector<32x128xf32>
    %cst_5 = arith.constant 0.000000e+00 : f32
    %6 = vector.broadcast %cst_5 : f32 to vector<32x128xf32>
    %7 = arith.cmpf ogt, %5, %6 : vector<32x128xf32>
    %cst_6 = arith.constant 0.000000e+00 : f32
    %8 = vector.broadcast %cst_6 : f32 to vector<32x128xf32>
    %9 = arith.minimumf %5, %8 : vector<32x128xf32>
    %10 = math.exp %9 : vector<32x128xf32>
    %cst_7 = arith.constant 1.000000e+00 : f32
    %11 = vector.broadcast %cst_7 : f32 to vector<32x128xf32>
    %12 = arith.subf %10, %11 : vector<32x128xf32>
    %13 = arith.select %7, %5, %12 : vector<32x128xi1>, vector<32x128xf32>
    %14 = arith.truncf %13 : vector<32x128xf32> to vector<32x128xbf16>
    %c0_8 = arith.constant 0 : index
    %c0_9 = arith.constant 0 : index
    %c0_10 = arith.constant 0 : index
    %15 = vector.load %arg4[%c0_8, %c0_9, %c0_10] : memref<2x128x128xbf16, #tpu.memory_space<vmem>>, vector<1x128x128xbf16>
    %16 = vector.shape_cast %15 : vector<1x128x128xbf16> to vector<128x128xbf16>
    %cst_11 = arith.constant dense<0.000000e+00> : vector<32x128xf32>
    %17 = tpu.matmul %14, %16, %cst_11 {dimension_numbers = #tpu.dot_dimension_numbers<[1], [0], [0], [1], [0, 0, 1, 1], [], []>} : vector<32x128xbf16>, vector<128x128xbf16>, vector<32x128xf32> -> vector<32x128xf32>
    %c0_12 = arith.constant 0 : index
    %c0_13 = arith.constant 0 : index
    %c0_14 = arith.constant 0 : index
    %18 = vector.load %arg5[%c0_12, %c0_13, %c0_14] : memref<2x1x128xf32, #tpu.memory_space<vmem>>, vector<1x1x128xf32>
    %19 = vector.shape_cast %18 : vector<1x1x128xf32> to vector<1x128xf32>
    %20 = vector.broadcast %19 : vector<1x128xf32> to vector<32x128xf32>
    %21 = arith.addf %17, %20 : vector<32x128xf32>
    %cst_15 = arith.constant 0.000000e+00 : f32
    %22 = vector.broadcast %cst_15 : f32 to vector<32x128xf32>
    %23 = arith.subf %22, %21 : vector<32x128xf32>
    %24 = math.exp %23 : vector<32x128xf32>
    %cst_16 = arith.constant 1.000000e+00 : f32
    %25 = vector.broadcast %cst_16 : f32 to vector<32x128xf32>
    %26 = arith.addf %25, %24 : vector<32x128xf32>
    %27 = tpu.reciprocal %26 {approx = true} : vector<32x128xf32> -> vector<32x128xf32>
    %28 = arith.mulf %21, %27 : vector<32x128xf32>
    %29 = arith.truncf %28 : vector<32x128xf32> to vector<32x128xbf16>
    %c0_17 = arith.constant 0 : index
    %c0_18 = arith.constant 0 : index
    %c0_19 = arith.constant 0 : index
    %30 = vector.load %arg6[%c0_17, %c0_18, %c0_19] : memref<2x128x128xbf16, #tpu.memory_space<vmem>>, vector<1x128x128xbf16>
    %31 = vector.shape_cast %30 : vector<1x128x128xbf16> to vector<128x128xbf16>
    %cst_20 = arith.constant dense<0.000000e+00> : vector<32x128xf32>
    %32 = tpu.matmul %29, %31, %cst_20 {dimension_numbers = #tpu.dot_dimension_numbers<[1], [0], [0], [1], [0, 0, 1, 1], [], []>} : vector<32x128xbf16>, vector<128x128xbf16>, vector<32x128xf32> -> vector<32x128xf32>
    %c0_21 = arith.constant 0 : index
    %c0_22 = arith.constant 0 : index
    %c0_23 = arith.constant 0 : index
    %33 = vector.load %arg7[%c0_21, %c0_22, %c0_23] : memref<2x1x128xf32, #tpu.memory_space<vmem>>, vector<1x1x128xf32>
    %34 = vector.shape_cast %33 : vector<1x1x128xf32> to vector<1x128xf32>
    %35 = vector.broadcast %34 : vector<1x128xf32> to vector<32x128xf32>
    %36 = arith.addf %32, %35 : vector<32x128xf32>
    %cst_24 = arith.constant 0.000000e+00 : f32
    %37 = vector.broadcast %cst_24 : f32 to vector<32x128xf32>
    %38 = arith.subf %37, %36 : vector<32x128xf32>
    %39 = math.exp %38 : vector<32x128xf32>
    %cst_25 = arith.constant 1.000000e+00 : f32
    %40 = vector.broadcast %cst_25 : f32 to vector<32x128xf32>
    %41 = arith.addf %40, %39 : vector<32x128xf32>
    %42 = tpu.reciprocal %41 {approx = true} : vector<32x128xf32> -> vector<32x128xf32>
    %43 = arith.mulf %36, %42 : vector<32x128xf32>
    %44 = arith.truncf %43 : vector<32x128xf32> to vector<32x128xbf16>
    %c0_26 = arith.constant 0 : index
    %c0_27 = arith.constant 0 : index
    %c0_28 = arith.constant 0 : index
    %45 = vector.load %arg8[%c0_26, %c0_27, %c0_28] : memref<2x128x128xbf16, #tpu.memory_space<vmem>>, vector<1x128x128xbf16>
    %46 = vector.shape_cast %45 : vector<1x128x128xbf16> to vector<128x128xbf16>
    %cst_29 = arith.constant dense<0.000000e+00> : vector<32x128xf32>
    %47 = tpu.matmul %44, %46, %cst_29 {dimension_numbers = #tpu.dot_dimension_numbers<[1], [0], [0], [1], [0, 0, 1, 1], [], []>} : vector<32x128xbf16>, vector<128x128xbf16>, vector<32x128xf32> -> vector<32x128xf32>
    %c0_30 = arith.constant 0 : index
    %c0_31 = arith.constant 0 : index
    %c0_32 = arith.constant 0 : index
    %48 = vector.load %arg9[%c0_30, %c0_31, %c0_32] : memref<2x1x128xf32, #tpu.memory_space<vmem>>, vector<1x1x128xf32>
    %49 = vector.shape_cast %48 : vector<1x1x128xf32> to vector<1x128xf32>
    %50 = vector.broadcast %49 : vector<1x128xf32> to vector<32x128xf32>
    %51 = arith.addf %47, %50 : vector<32x128xf32>
    %cst_33 = arith.constant 0.000000e+00 : f32
    %52 = vector.broadcast %cst_33 : f32 to vector<32x128xf32>
    %53 = arith.subf %52, %51 : vector<32x128xf32>
    %54 = math.exp %53 : vector<32x128xf32>
    %cst_34 = arith.constant 1.000000e+00 : f32
    %55 = vector.broadcast %cst_34 : f32 to vector<32x128xf32>
    %56 = arith.addf %55, %54 : vector<32x128xf32>
    %57 = tpu.reciprocal %56 {approx = true} : vector<32x128xf32> -> vector<32x128xf32>
    %58 = arith.mulf %51, %57 : vector<32x128xf32>
    %cst_35 = arith.constant 5.000000e-01 : f32
    %59 = vector.broadcast %cst_35 : f32 to vector<32x128xf32>
    %60 = arith.mulf %59, %13 : vector<32x128xf32>
    %61 = arith.addf %58, %60 : vector<32x128xf32>
    %62 = arith.truncf %61 : vector<32x128xf32> to vector<32x128xbf16>
    %c1 = arith.constant 1 : index
    %c0_36 = arith.constant 0 : index
    %c0_37 = arith.constant 0 : index
    %63 = vector.load %arg4[%c1, %c0_36, %c0_37] : memref<2x128x128xbf16, #tpu.memory_space<vmem>>, vector<1x128x128xbf16>
    %64 = vector.shape_cast %63 : vector<1x128x128xbf16> to vector<128x128xbf16>
    %cst_38 = arith.constant dense<0.000000e+00> : vector<32x128xf32>
    %65 = tpu.matmul %62, %64, %cst_38 {dimension_numbers = #tpu.dot_dimension_numbers<[1], [0], [0], [1], [0, 0, 1, 1], [], []>} : vector<32x128xbf16>, vector<128x128xbf16>, vector<32x128xf32> -> vector<32x128xf32>
    %c1_39 = arith.constant 1 : index
    %c0_40 = arith.constant 0 : index
    %c0_41 = arith.constant 0 : index
    %66 = vector.load %arg5[%c1_39, %c0_40, %c0_41] : memref<2x1x128xf32, #tpu.memory_space<vmem>>, vector<1x1x128xf32>
    %67 = vector.shape_cast %66 : vector<1x1x128xf32> to vector<1x128xf32>
    %68 = vector.broadcast %67 : vector<1x128xf32> to vector<32x128xf32>
    %69 = arith.addf %65, %68 : vector<32x128xf32>
    %cst_42 = arith.constant 0.000000e+00 : f32
    %70 = vector.broadcast %cst_42 : f32 to vector<32x128xf32>
    %71 = arith.subf %70, %69 : vector<32x128xf32>
    %72 = math.exp %71 : vector<32x128xf32>
    %cst_43 = arith.constant 1.000000e+00 : f32
    %73 = vector.broadcast %cst_43 : f32 to vector<32x128xf32>
    %74 = arith.addf %73, %72 : vector<32x128xf32>
    %75 = tpu.reciprocal %74 {approx = true} : vector<32x128xf32> -> vector<32x128xf32>
    %76 = arith.mulf %69, %75 : vector<32x128xf32>
    %77 = arith.truncf %76 : vector<32x128xf32> to vector<32x128xbf16>
    %c1_44 = arith.constant 1 : index
    %c0_45 = arith.constant 0 : index
    %c0_46 = arith.constant 0 : index
    %78 = vector.load %arg6[%c1_44, %c0_45, %c0_46] : memref<2x128x128xbf16, #tpu.memory_space<vmem>>, vector<1x128x128xbf16>
    %79 = vector.shape_cast %78 : vector<1x128x128xbf16> to vector<128x128xbf16>
    %cst_47 = arith.constant dense<0.000000e+00> : vector<32x128xf32>
    %80 = tpu.matmul %77, %79, %cst_47 {dimension_numbers = #tpu.dot_dimension_numbers<[1], [0], [0], [1], [0, 0, 1, 1], [], []>} : vector<32x128xbf16>, vector<128x128xbf16>, vector<32x128xf32> -> vector<32x128xf32>
    %c1_48 = arith.constant 1 : index
    %c0_49 = arith.constant 0 : index
    %c0_50 = arith.constant 0 : index
    %81 = vector.load %arg7[%c1_48, %c0_49, %c0_50] : memref<2x1x128xf32, #tpu.memory_space<vmem>>, vector<1x1x128xf32>
    %82 = vector.shape_cast %81 : vector<1x1x128xf32> to vector<1x128xf32>
    %83 = vector.broadcast %82 : vector<1x128xf32> to vector<32x128xf32>
    %84 = arith.addf %80, %83 : vector<32x128xf32>
    %cst_51 = arith.constant 0.000000e+00 : f32
    %85 = vector.broadcast %cst_51 : f32 to vector<32x128xf32>
    %86 = arith.subf %85, %84 : vector<32x128xf32>
    %87 = math.exp %86 : vector<32x128xf32>
    %cst_52 = arith.constant 1.000000e+00 : f32
    %88 = vector.broadcast %cst_52 : f32 to vector<32x128xf32>
    %89 = arith.addf %88, %87 : vector<32x128xf32>
    %90 = tpu.reciprocal %89 {approx = true} : vector<32x128xf32> -> vector<32x128xf32>
    %91 = arith.mulf %84, %90 : vector<32x128xf32>
    %92 = arith.truncf %91 : vector<32x128xf32> to vector<32x128xbf16>
    %c1_53 = arith.constant 1 : index
    %c0_54 = arith.constant 0 : index
    %c0_55 = arith.constant 0 : index
    %93 = vector.load %arg8[%c1_53, %c0_54, %c0_55] : memref<2x128x128xbf16, #tpu.memory_space<vmem>>, vector<1x128x128xbf16>
    %94 = vector.shape_cast %93 : vector<1x128x128xbf16> to vector<128x128xbf16>
    %cst_56 = arith.constant dense<0.000000e+00> : vector<32x128xf32>
    %95 = tpu.matmul %92, %94, %cst_56 {dimension_numbers = #tpu.dot_dimension_numbers<[1], [0], [0], [1], [0, 0, 1, 1], [], []>} : vector<32x128xbf16>, vector<128x128xbf16>, vector<32x128xf32> -> vector<32x128xf32>
    %c1_57 = arith.constant 1 : index
    %c0_58 = arith.constant 0 : index
    %c0_59 = arith.constant 0 : index
    %96 = vector.load %arg9[%c1_57, %c0_58, %c0_59] : memref<2x1x128xf32, #tpu.memory_space<vmem>>, vector<1x1x128xf32>
    %97 = vector.shape_cast %96 : vector<1x1x128xf32> to vector<1x128xf32>
    %98 = vector.broadcast %97 : vector<1x128xf32> to vector<32x128xf32>
    %99 = arith.addf %95, %98 : vector<32x128xf32>
    %cst_60 = arith.constant 0.000000e+00 : f32
    %100 = vector.broadcast %cst_60 : f32 to vector<32x128xf32>
    %101 = arith.subf %100, %99 : vector<32x128xf32>
    %102 = math.exp %101 : vector<32x128xf32>
    %cst_61 = arith.constant 1.000000e+00 : f32
    %103 = vector.broadcast %cst_61 : f32 to vector<32x128xf32>
    %104 = arith.addf %103, %102 : vector<32x128xf32>
    %105 = tpu.reciprocal %104 {approx = true} : vector<32x128xf32> -> vector<32x128xf32>
    %106 = arith.mulf %99, %105 : vector<32x128xf32>
    %cst_62 = arith.constant 5.000000e-01 : f32
    %107 = vector.broadcast %cst_62 : f32 to vector<32x128xf32>
    %108 = arith.mulf %107, %61 : vector<32x128xf32>
    %109 = arith.addf %106, %108 : vector<32x128xf32>
    %110 = arith.truncf %109 : vector<32x128xf32> to vector<32x128xbf16>
    %c0_63 = arith.constant 0 : index
    %c0_64 = arith.constant 0 : index
    %111 = vector.load %arg10[%c0_63, %c0_64] : memref<128x16xbf16, #tpu.memory_space<vmem>>, vector<128x16xbf16>
    %cst_65 = arith.constant dense<0.000000e+00> : vector<32x16xf32>
    %112 = tpu.matmul %110, %111, %cst_65 {dimension_numbers = #tpu.dot_dimension_numbers<[1], [0], [0], [1], [0, 0, 1, 1], [], []>} : vector<32x128xbf16>, vector<128x16xbf16>, vector<32x16xf32> -> vector<32x16xf32>
    %c0_66 = arith.constant 0 : index
    %c0_67 = arith.constant 0 : index
    %113 = vector.load %arg11[%c0_66, %c0_67] : memref<1x16xf32, #tpu.memory_space<vmem>>, vector<1x16xf32>
    %114 = vector.broadcast %113 : vector<1x16xf32> to vector<32x16xf32>
    %115 = arith.addf %112, %114 : vector<32x16xf32>
    %c0_68 = arith.constant 0 : index
    %c0_69 = arith.constant 0 : index
    %116 = vector.load %arg12[%c0_68, %c0_69] : memref<32x16xf32, #tpu.memory_space<vmem>>, vector<32x16xf32>
    tpu.vector_store %arg12[%c0_68, %c0_69], %115 {strides = array<i32>} : memref<32x16xf32, #tpu.memory_space<vmem>>, vector<32x16xf32>,
    return
  }
  func.func @transform_0(%arg0: i32) -> (i32, i32) {
    %c0_i32 = arith.constant 0 : i32
    %c0_i32_0 = arith.constant 0 : i32
    return %arg0, %c0_i32 : i32, i32
  }
  func.func @transform_1(%arg0: i32) -> (i32, i32) {
    %c0_i32 = arith.constant 0 : i32
    %c0_i32_0 = arith.constant 0 : i32
    %c0_i32_1 = arith.constant 0 : i32
    return %c0_i32, %c0_i32_0 : i32, i32
  }
  func.func @transform_2(%arg0: i32) -> (i32, i32) {
    %c0_i32 = arith.constant 0 : i32
    %c0_i32_0 = arith.constant 0 : i32
    %c0_i32_1 = arith.constant 0 : i32
    return %c0_i32, %c0_i32_0 : i32, i32
  }
  func.func @transform_3(%arg0: i32) -> (i32, i32, i32) {
    %c0_i32 = arith.constant 0 : i32
    %c0_i32_0 = arith.constant 0 : i32
    %c0_i32_1 = arith.constant 0 : i32
    %c0_i32_2 = arith.constant 0 : i32
    return %c0_i32, %c0_i32_0, %c0_i32_1 : i32, i32, i32
  }
  func.func @transform_4(%arg0: i32) -> (i32, i32, i32) {
    %c0_i32 = arith.constant 0 : i32
    %c0_i32_0 = arith.constant 0 : i32
    %c0_i32_1 = arith.constant 0 : i32
    %c0_i32_2 = arith.constant 0 : i32
    return %c0_i32, %c0_i32_0, %c0_i32_1 : i32, i32, i32
  }
  func.func @transform_5(%arg0: i32) -> (i32, i32, i32) {
    %c0_i32 = arith.constant 0 : i32
    %c0_i32_0 = arith.constant 0 : i32
    %c0_i32_1 = arith.constant 0 : i32
    %c0_i32_2 = arith.constant 0 : i32
    return %c0_i32, %c0_i32_0, %c0_i32_1 : i32, i32, i32
  }
  func.func @transform_6(%arg0: i32) -> (i32, i32, i32) {
    %c0_i32 = arith.constant 0 : i32
    %c0_i32_0 = arith.constant 0 : i32
    %c0_i32_1 = arith.constant 0 : i32
    %c0_i32_2 = arith.constant 0 : i32
    return %c0_i32, %c0_i32_0, %c0_i32_1 : i32, i32, i32
  }
  func.func @transform_7(%arg0: i32) -> (i32, i32, i32) {
    %c0_i32 = arith.constant 0 : i32
    %c0_i32_0 = arith.constant 0 : i32
    %c0_i32_1 = arith.constant 0 : i32
    %c0_i32_2 = arith.constant 0 : i32
    return %c0_i32, %c0_i32_0, %c0_i32_1 : i32, i32, i32
  }
  func.func @transform_8(%arg0: i32) -> (i32, i32, i32) {
    %c0_i32 = arith.constant 0 : i32
    %c0_i32_0 = arith.constant 0 : i32
    %c0_i32_1 = arith.constant 0 : i32
    %c0_i32_2 = arith.constant 0 : i32
    return %c0_i32, %c0_i32_0, %c0_i32_1 : i32, i32, i32
  }
  func.func @transform_9(%arg0: i32) -> (i32, i32) {
    %c0_i32 = arith.constant 0 : i32
    %c0_i32_0 = arith.constant 0 : i32
    %c0_i32_1 = arith.constant 0 : i32
    return %c0_i32, %c0_i32_0 : i32, i32
  }
  func.func @transform_10(%arg0: i32) -> (i32, i32) {
    %c0_i32 = arith.constant 0 : i32
    %c0_i32_0 = arith.constant 0 : i32
    %c0_i32_1 = arith.constant 0 : i32
    return %c0_i32, %c0_i32_0 : i32, i32
  }
  func.func @transform_11(%arg0: i32) -> (i32, i32) {
    %c0_i32 = arith.constant 0 : i32
    %c0_i32_0 = arith.constant 0 : i32
    return %arg0, %c0_i32 : i32, i32
  }
}

</mosaic_0001>

<bundles_post_ra>
// kernel: tpu_custom_call.1
= control target key start
LH: loop header
LB: loop body
LE: loop exit
PB: predicated region body
PF: predicated region fallthrough
CT: control target
= control target key end

     0   :  { %16 = vsyncpa [#allocation3], 0  ;;  %s2726_s0 = inlined_call_operand.vmem [shape: bf16[64,32], index: 0, kind: input, shape index: {}]   ;;  %s2727_s1 = inlined_call_operand.hbm [shape: bf16[32,128], index: 1, kind: input, shape index: {}]   ;;  %s2728_s2 = inlined_call_operand.hbm [shape: f32[1,128], index: 2, kind: input, shape index: {}]   ;;  %s2729_s3 = inlined_call_operand.vmem [shape: bf16[2,128,128], index: 3, kind: input, shape index: {}]   ;;  %s2730_s4 = inlined_call_operand.vmem [shape: f32[2,1,128], index: 4, kind: input, shape index: {}]   ;;  %s2731_s5 = inlined_call_operand.hbm [shape: bf16[2,128,128], index: 5, kind: input, shape index: {}]   ;;  %s2732_s6 = inlined_call_operand.vmem [shape: f32[2,1,128], index: 6, kind: input, shape index: {}]   ;;  %s2733_s7 = inlined_call_operand.hbm [shape: bf16[2,128,128], index: 7, kind: input, shape index: {}]   ;;  %s2734_s8 = inlined_call_operand.vmem [shape: f32[2,1,128], index: 8, kind: input, shape index: {}]   ;;  %s2735_s9 = inlined_call_operand.vmem [shape: bf16[128,16], index: 9, kind: input, shape index: {}]   ;;  %s2736_s10 = inlined_call_operand.vmem [shape: f32[1,16], index: 10, kind: input, shape index: {}]   ;;  %s2737_s11 = inlined_call_operand.vmem [shape: f32[64,16], index: 11, kind: output, shape index: {}]  }
   0x1   :  { %17 = vsyncpa [#allocation5], 0 }
   0x2   :  { %18 = vsyncpa [#allocation8], 0  ;;  %s2434_s17 = smov 0  }
   0x3 LB: > { %s2368_s18 = smov [#allocation4]   ;;  %s2738_s20 = sadd.s32 4294967295, %s2366_s17   ;;  %s2366_s17 = sphi %s2434_s17, %s24_s17  }
   0x4   : > { %s317_s19 = sshll.u32 %s2368_s18, 4  ;;  %p1689_p0 = scmp.ge.s32.totalorder %s2366_s17, 1  ;;  %s2448_s19 = int_to_ptr.vmem [resolvable:$true] %s317_s19 }
   0x5   : > { %p291_p1 = scmp.lt.s32.totalorder %s2366_s17, 3  ;;  %p2444_p2 = scmp.eq.s32.totalorder %s2738_s20, 0 }
   0x6   : > { %s2369_s23 = smov [#allocation2]   ;;  %s2370_s26 = smov [#allocation6]  }
   0x7   : > { %s2742_s21 = scalar_select %p2444_p2, 1, 0 }
   0x8   : > { %p2450_p3 = pnand %p1689_p0, %p291_p1  ;;  %s303_s24 = sshll.u32 %s2369_s23, 4  ;;  %s2456_s24 = int_to_ptr.vmem [resolvable:$true] %s303_s24 }
   0x9   : > { %s333_s27 = sshll.u32 %s2370_s26, 4  ;;  %s2371_s28 = smov [#allocation7]   ;;  %s2464_s27 = int_to_ptr.vmem [resolvable:$true] %s333_s27 }
   0xa   : > { %s2743_s22 = scalar_select %p2450_p3, 1, 0 }
   0xb   : > { %p2037_p4 = pneg %p2450_p3  ;;  %s2466_s29 = sshll.u32 %s2371_s28, 4  ;;  %s350_s29 = int_to_ptr.vmem [resolvable:$true] %s2466_s29 }
   0xc   : > { %s2236_s13 = scalar_lea.hbm %s2728_s2, 16 }
   0xd   : > { %p2460_p5 = pnand %p2444_p2, %p2037_p4  ;;  %p2237_p6 = scmp.ne.s32.totalorder %s2728_s2, %s2236_s13 }
   0xe   : > { %p2243_p10 = scmp.lt.u32.totalorder %s2236_s13, %s2728_s2 }
   0xf   : > { %p2476_p7 = pneg %p2460_p5 }
  0x11   : > { %p2239_p8 = pnand %p2476_p7, %p2237_p6 }
  0x13   : > { %p2240_p9 = pneg %p2239_p8 }
  0x15   : > { %p2245_p11 = pnand %p2243_p10, %p2240_p9 }
  0x17   : > { %2248 = shalt.err (!%p2245_p11)
}
  0x18   : > { %s2249_s26 = scalar_lea.vmem %s2448_s19, 16  ;;  %s2256_s28 = scalar_lea.vmem %s2448_s19, 32 }
  0x19   : > { %p2250_p12 = scmp.ne.s32.totalorder %s2448_s19, %s2249_s26  ;;  %p2257_p1 = scmp.lt.s32.totalorder %s2448_s19, %s2448_s19 }
  0x1a   : > { %p2258_p4 = scmp.lt.s32.totalorder %s2256_s28, %s2249_s26 }
  0x1b   : > { %p2252_p13 = pnand %p2250_p12, %p2476_p7 }
  0x1c   : > { %p2259_p6 = por %p2258_p4, %p2257_p1 }
  0x1d   : > { %p2253_p0 = pneg %p2252_p13 }
  0x1f   : > { %p2260_p8 = pnand %p2259_p6, %p2253_p0 }
  0x21   : > { %2263 = shalt.err (!%p2260_p8)
}
  0x22   : > { %2043 = dma.hbm_to_vmem [thread:$0]  (!%p2460_p5), %s2728_s2, 16, %s2448_s19, [#allocation5]  }
  0x23   : > { %s2264_s15 = scalar_lea.hbm %s2727_s1, 256 }
  0x24   : > { %p2265_p9 = scmp.ne.s32.totalorder %s2727_s1, %s2264_s15  ;;  %p2271_p12 = scmp.lt.u32.totalorder %s2264_s15, %s2727_s1 }
  0x26   : > { %p2267_p10 = pnand %p2265_p9, %p2476_p7 }
  0x28   : > { %p2268_p11 = pneg %p2267_p10 }
  0x2a   : > { %p2273_p13 = pnand %p2271_p12, %p2268_p11 }
  0x2c   : > { %2276 = shalt.err (!%p2273_p13)
}
  0x2d   : > { %s2277_s19 = scalar_lea.vmem %s2456_s24, 256  ;;  %p2285_p6 = scmp.lt.s32.totalorder %s2456_s24, %s2456_s24 }
  0x2e   : > { %p2278_p0 = scmp.ne.s32.totalorder %s2456_s24, %s2277_s19  ;;  %p2286_p8 = scmp.lt.s32.totalorder %s2277_s19, %s2277_s19 }
  0x30   : > { %p2280_p1 = pnand %p2278_p0, %p2476_p7  ;;  %p2287_p9 = por %p2286_p8, %p2285_p6 }
  0x32   : > { %p2281_p4 = pneg %p2280_p1 }
  0x34   : > { %p2288_p10 = pnand %p2287_p9, %p2281_p4 }
  0x36   : > { %2291 = shalt.err (!%p2288_p10)
}
  0x37   : > { %s2372_s30 = smov 64   ;;  %s2373_s12 = smov 4  }
  0x38   : > { %2040 = dma.hbm_to_vmem [thread:$0]  (!%p2460_p5), %s2727_s1, 256, %s2456_s24, [#allocation3], %s2372_s30, %s2372_s30, %s2373_s12  }
  0x39   : > { %s2292_s23 = scalar_lea.hbm %s2731_s5, 2048 }
  0x3a   : > { %p2293_p11 = scmp.ne.s32.totalorder %s2731_s5, %s2292_s23  ;;  %p2299_p0 = scmp.lt.u32.totalorder %s2292_s23, %s2731_s5 }
  0x3c   : > { %p2295_p12 = pnand %p2293_p11, %p2476_p7 }
  0x3e   : > { %p2296_p13 = pneg %p2295_p12 }
  0x40   : > { %p2301_p1 = pnand %p2299_p0, %p2296_p13 }
  0x42   : > { %2304 = shalt.err (!%p2301_p1)
}
  0x43   : > { %s2305_s24 = scalar_lea.vmem %s2464_s27, 2048  ;;  %p2313_p9 = scmp.lt.s32.totalorder %s2464_s27, %s2464_s27 }
  0x44   : > { %p2306_p4 = scmp.ne.s32.totalorder %s2464_s27, %s2305_s24  ;;  %p2314_p10 = scmp.lt.s32.totalorder %s2305_s24, %s2305_s24 }
  0x46   : > { %p2308_p6 = pnand %p2306_p4, %p2476_p7  ;;  %p2315_p11 = por %p2314_p10, %p2313_p9 }
  0x48   : > { %p2309_p8 = pneg %p2308_p6 }
  0x4a   : > { %p2316_p12 = pnand %p2315_p11, %p2309_p8 }
  0x4c   : > { %2319 = shalt.err (!%p2316_p12)
}
  0x4d   : > { %2046 = dma.hbm_to_vmem [thread:$0]  (!%p2460_p5), %s2731_s5, 2048, %s2464_s27, [#allocation5], %s2372_s30, %s2372_s30, %s2373_s12  }
  0x4e   : > { %s2320_s18 = scalar_lea.hbm %s2733_s7, 2048 }
  0x4f   : > { %p2321_p13 = scmp.ne.s32.totalorder %s2733_s7, %s2320_s18  ;;  %p2327_p4 = scmp.lt.u32.totalorder %s2320_s18, %s2733_s7 }
  0x51   : > { %p2323_p0 = pnand %p2321_p13, %p2476_p7 }
  0x53   : > { %p2324_p1 = pneg %p2323_p0 }
  0x55   : > { %p2329_p6 = pnand %p2327_p4, %p2324_p1 }
  0x57   : > { %2332 = shalt.err (!%p2329_p6)
}
  0x58   : > { %s2333_s24 = scalar_lea.vmem %s350_s29, 2048  ;;  %p2341_p11 = scmp.lt.s32.totalorder %s350_s29, %s350_s29 }
  0x59   : > { %p2334_p8 = scmp.ne.s32.totalorder %s350_s29, %s2333_s24  ;;  %p2342_p12 = scmp.lt.s32.totalorder %s2333_s24, %s2333_s24 }
  0x5b   : > { %p2336_p9 = pnand %p2334_p8, %p2476_p7  ;;  %p2343_p2 = por %p2342_p12, %p2341_p11 }
  0x5d   : > { %p2337_p10 = pneg %p2336_p9 }
  0x5f   : > { %p2344_p3 = pnand %p2343_p2, %p2337_p10 }
  0x61   : > { %2347 = shalt.err (!%p2344_p3)
}
  0x62   : > { %2049 = dma.hbm_to_vmem [thread:$0]  (!%p2460_p5), %s2733_s7, 2048, %s350_s29, [#allocation8], %s2372_s30, %s2372_s30, %s2373_s12  }
  0x63   : > { %p2746_p13 = scmp.ne.s32.totalorder %s2743_s22, 0 }
  0x64   : > { %p2747_p7 = scmp.ne.s32.totalorder (!%p2746_p13), %s2742_s21, 0 }
  0x65   : > { %383 = sbr.rel (%p2746_p13) target bundleno = 2082 (0x822), region = 64 }
  0x6c   : > { %2353 = dma.done.wait (%p2747_p7), [#allocation3], 256  }
  0x6d   : > { %2355 = vsyncadd (%p2747_p7), [#allocation3], 4294967040 }
  0x6e   : > { %2357 = dma.done.wait (%p2747_p7), [#allocation5], 2064  }
  0x6f   : > { %2359 = vsyncadd (%p2747_p7), [#allocation5], 4294965232 }
  0x70   : > { %2361 = dma.done.wait (%p2747_p7), [#allocation8], 2048  }
  0x71   : > { %2363 = vsyncadd (%p2747_p7), [#allocation8], 4294965248  ;;  %s2748_s22 = sadd.s32 4294967295, %s2366_s17   ;;  %v2072_v0 = vld [vmem:[#allocation2] sm:$0xff]   ;;  %v2073_v1 = vld [vmem:[#allocation2 + $0x8] sm:$0xff]   ;;  %vm485_vm0 = vcmask 261120  }
  0x72   : > { %s1700_s25 = sshll.u32 %s2748_s22, 2  ;;  %1873 = vmatprep.subr.bf16.mxu0 %v2072_v0  ;;  %v2076_v4 = vld [vmem:[%s2729_s3] sm:$0xff]   ;;  %v2077_v5 = vld [vmem:[%s2729_s3 + $0x8] sm:$0xff]   ;;  %v2078_v6 = vld [vmem:[%s2729_s3 + $0x10] sm:$0xff]   ;;  %vm1585_vm5 = vcmask 130048  }
  0x73   : > { %p436_p2 = scmp.lt.s32.totalorder %s1700_s25, 7  ;;  %1874 = vmatpush3.bf16.msra.mxu0 %v2072_v0  ;;  %1881 = vmatprep.subr.bf16.mxu1 %v2076_v4  ;;  %v2079_v7 = vld [vmem:[%s2729_s3 + $0x18] sm:$0xff]   ;;  %v2080_v8 = vld [vmem:[%s2729_s3 + $0x20] sm:$0xff]   ;;  %v2081_v9 = vld [vmem:[%s2729_s3 + $0x28] sm:$0xff]  }
  0x74   : > { %1875 = vmatprep.subr.bf16.mxu0 %v2073_v1  ;;  %1882 = vmatpush3.bf16.msra.mxu1 %v2076_v4  ;;  %v2082_v10 = vld [vmem:[%s2729_s3 + $0x30] sm:$0xff]   ;;  %v2083_v11 = vld [vmem:[%s2729_s3 + $0x38] sm:$0xff]   ;;  %v2086_v45 = vld [vmem:[#allocation6 + $0x10] sm:$0xff]  }
  0x75   : > { %s2750_s25 = smov (!%p436_p2, %s1700_s25), 7  ;;  %1883 = vmatprep.subr.bf16.mxu1 %v2077_v5  ;;  %v1704_v12 = vld [vmem:[#allocation4] ss:$0 sm:$0xff]  ;;  %v2084_v43 = vld [vmem:[#allocation6] sm:$0xff]   ;;  %v2085_v44 = vld [vmem:[#allocation6 + $0x8] sm:$0xff]  }
  0x76   : > { %s1701_s29 = sshll.u32 %s2750_s25, 2  ;;  %v2087_v46 = vld [vmem:[#allocation6 + $0x18] sm:$0xff]   ;;  %v2088_v47 = vld [vmem:[#allocation6 + $0x20] sm:$0xff]   ;;  %v2089_v48 = vld [vmem:[#allocation6 + $0x28] sm:$0xff]   ;;  %s1703_s24 = sshll.u32 %s2750_s25, 3 }
  0x77   : > { %s439_s12 = scalar_lea.vmem %s2726_s0, %s1701_s29  ;;  %1876 = vmatpush3.bf16.msra.mxu0 %v2073_v1  ;;  %v2090_v49 = vld [vmem:[#allocation6 + $0x30] sm:$0xff]   ;;  %v2091_v50 = vld [vmem:[#allocation6 + $0x38] sm:$0xff]   ;;  %v1715_v51 = vld [vmem:[%s2730_s4] ss:$0 sm:$0xff]  ;;  %s445_s16 = scalar_lea.vmem %s2737_s11, %s1703_s24 }
  0x78   : > { %v2074_v2 = vld [vmem:[%s439_s12] sm:$0xff]   ;;  %v2075_v3 = vld [vmem:[%s439_s12 + $0x8] sm:$0xff]   ;;  %1884 = vmatpush3.bf16.msra.mxu1 %v2077_v5  ;;  %1901 = vmatprep.subr.bf16.mxu0 %v2084_v43 }
  0x79   : > { %1877 = vmatprep.mubr.msk.bf16.mxu0 %vm485_vm0, %v2074_v2  ;;  %1885 = vmatprep.subr.bf16.mxu1 %v2078_v6 }
  0x7a   : > { %1878 = vmatmul.mubr.msk.bf16.vlgmr.msra.gmra.mrb[0].mxu0 %vm485_vm0, %v2075_v3 }
  0x7b   : > { %1902 = vmatpush3.bf16.msra.mxu0 %v2084_v43 }
  0x7c   : > { %1886 = vmatpush3.bf16.msra.mxu1 %v2078_v6  ;;  %1903 = vmatprep.subr.bf16.mxu0 %v2085_v44 }
  0x7d   : > { %1887 = vmatprep.subr.bf16.mxu1 %v2079_v7 }
  0x7f   : > { %1904 = vmatpush3.bf16.msra.mxu0 %v2085_v44 }
  0x80   : > { %1888 = vmatpush3.bf16.msra.mxu1 %v2079_v7  ;;  %1905 = vmatprep.subr.bf16.mxu0 %v2086_v45 }
  0x81   : > { %1889 = vmatprep.subr.bf16.mxu1 %v2080_v8 }
  0x83   : > { %1906 = vmatpush3.bf16.msra.mxu0 %v2086_v45 }
  0x84   : > { %1890 = vmatpush3.bf16.msra.mxu1 %v2080_v8  ;;  %1907 = vmatprep.subr.bf16.mxu0 %v2087_v46 }
  0x85   : > { %1891 = vmatprep.subr.bf16.mxu1 %v2081_v9 }
  0x87   : > { %1908 = vmatpush3.bf16.msra.mxu0 %v2087_v46 }
  0x88   : > { %1892 = vmatpush3.bf16.msra.mxu1 %v2081_v9  ;;  %1909 = vmatprep.subr.bf16.mxu0 %v2088_v47 }
  0x89   : > { %1893 = vmatprep.subr.bf16.mxu1 %v2082_v10 }
  0x8b   : > { %1910 = vmatpush3.bf16.msra.mxu0 %v2088_v47 }
  0x8c   : > { %1894 = vmatpush3.bf16.msra.mxu1 %v2082_v10  ;;  %1911 = vmatprep.subr.bf16.mxu0 %v2089_v48 }
  0x8d   : > { %1895 = vmatprep.subr.bf16.mxu1 %v2083_v11 }
  0x8f   : > { %1912 = vmatpush3.bf16.msra.mxu0 %v2089_v48 }
  0x90   : > { %1896 = vmatpush3.bf16.msra.mxu1 %v2083_v11  ;;  %1913 = vmatprep.subr.bf16.mxu0 %v2090_v49 }
  0x93   : > { %1914 = vmatpush3.bf16.msra.mxu0 %v2090_v49 }
  0x94   : > { %1915 = vmatprep.subr.bf16.mxu0 %v2091_v50 }
  0x97   : > { %1916 = vmatpush3.bf16.msra.mxu0 %v2091_v50 }
 0x14d   : > { %v1879_v13 = vpop.f32.mrb[0].mxu0 }
 0x14e   : > { %v535_v14 = vadd.f32 %v1879_v13, %v1704_v12  ;;  %v526_v15 = vpop.f32.mrb[1].mxu0 }
 0x14f   : > { %v527_v16 = vadd.f32 %v1704_v12, %v526_v15  ;;  %v1880_v17 = vpop.f32.mrb[2].mxu0 }
 0x150   : > { %v547_v18 = vmin.f32 %v535_v14, 0.0  ;;  %v538_v19 = vadd.f32 %v1880_v17, %v1704_v12  ;;  %v529_v20 = vpop.f32.mrb[3].mxu0  ;;  %vm543_vm1 = vcmp.gt.f32.partialorder %v535_v14, 0.0 }
 0x151   : > { %v545_v21 = vmin.f32 %v527_v16, 0.0  ;;  %v530_v22 = vadd.f32 %v1704_v12, %v529_v20  ;;  %vm541_vm3 = vcmp.gt.f32.partialorder %v527_v16, 0.0 }
 0x152   : > { %v553_v23 = vmul.f32 1.442695, %v547_v18  ;;  %v548_v24 = vmin.f32 %v538_v19, 0.0  ;;  %vm544_vm2 = vcmp.gt.f32.partialorder %v538_v19, 0.0 }
 0x153   : > { %v549_v25 = vmul.f32 1.442695, %v545_v21  ;;  %v546_v26 = vmin.f32 %v530_v22, 0.0  ;;  %vm542_vm4 = vcmp.gt.f32.partialorder %v530_v22, 0.0 }
 0x154   : > { %2132 = vpow2.f32 %v553_v23  ;;  %v555_v27 = vmul.f32 1.442695, %v548_v24  ;;  %v2093_v23 = vld [vmem:[#allocation7 + $0x8] sm:$0xff]   ;;  %v2094_v24 = vld [vmem:[#allocation7 + $0x10] sm:$0xff]  }
 0x155   : > { %2134 = vpow2.f32 %v549_v25  ;;  %v551_v28 = vmul.f32 1.442695, %v546_v26  ;;  %v2095_v25 = vld [vmem:[#allocation7 + $0x18] sm:$0xff]   ;;  %v2096_v26 = vld [vmem:[#allocation7 + $0x20] sm:$0xff]  }
 0x156   : > { %2136 = vpow2.f32 %v555_v27  ;;  %v2097_v27 = vld [vmem:[#allocation7 + $0x28] sm:$0xff]  }
 0x157   : > { %2138 = vpow2.f32 %v551_v28  ;;  %v2098_v28 = vld [vmem:[#allocation7 + $0x30] sm:$0xff]  }
 0x15e   : > { %v2133_v29 = vpop.eup %2132 }
 0x15f   : > { %v2135_v30 = vpop.eup %2134  ;;  %v1713_v31 = vadd.f32 -1.0, %v2133_v29  ;;  %v2099_v29 = vld [vmem:[#allocation7 + $0x38] sm:$0xff]  }
 0x160   : > { %v2137_v32 = vpop.eup %2136  ;;  %v1711_v33 = vadd.f32 -1.0, %v2135_v30  ;;  %v1724_v30 = vld [vmem:[%s2732_s6] ss:$0 sm:$0xff] }
 0x161   : > { %v2139_v34 = vpop.eup %2138  ;;  %v1714_v35 = vadd.f32 -1.0, %v2137_v32  ;;  %v2618_v37 = vsel %vm543_vm1, %v535_v14, %v1713_v31 }
 0x162   : > { %v1712_v36 = vadd.f32 -1.0, %v2139_v34  ;;  %v2622_v39 = vsel %vm541_vm3, %v527_v16, %v1711_v33 }
 0x163   : > { %v2620_v38 = vsel %vm544_vm2, %v538_v19, %v1714_v35 }
 0x164   : > { %v2624_v40 = vsel %vm542_vm4, %v530_v22, %v1712_v36  ;;  %v566_v41 = vpack.c.bf16 %v2620_v38, %v2618_v37  ;;  %v2092_v22 = vld [vmem:[#allocation7] sm:$0xff]  }
 0x165   : > { %v565_v42 = vpack.c.bf16 %v2624_v40, %v2622_v39  ;;  %1921 = vmatprep.subr.bf16.mxu1 %v2092_v22 }
 0x167   : > { %1897 = vmatprep.mubr.bf16.mxu1 %v565_v42 }
 0x168   : > { %1898 = vmatmul.mubr.bf16.vlgmr.msra.gmra.mrb[0].mxu1 %v566_v41 }
 0x169   : > { %1922 = vmatpush3.bf16.msra.mxu1 %v2092_v22 }
 0x16a   : > { %1923 = vmatprep.subr.bf16.mxu1 %v2093_v23 }
 0x16d   : > { %1924 = vmatpush3.bf16.msra.mxu1 %v2093_v23 }
 0x16e   : > { %1925 = vmatprep.subr.bf16.mxu1 %v2094_v24 }
 0x171   : > { %1926 = vmatpush3.bf16.msra.mxu1 %v2094_v24 }
 0x172   : > { %1927 = vmatprep.subr.bf16.mxu1 %v2095_v25 }
 0x175   : > { %1928 = vmatpush3.bf16.msra.mxu1 %v2095_v25 }
 0x176   : > { %1929 = vmatprep.subr.bf16.mxu1 %v2096_v26 }
 0x179   : > { %1930 = vmatpush3.bf16.msra.mxu1 %v2096_v26 }
 0x17a   : > { %1931 = vmatprep.subr.bf16.mxu1 %v2097_v27 }
 0x17d   : > { %1932 = vmatpush3.bf16.msra.mxu1 %v2097_v27 }
 0x17e   : > { %1933 = vmatprep.subr.bf16.mxu1 %v2098_v28 }
 0x181   : > { %1934 = vmatpush3.bf16.msra.mxu1 %v2098_v28 }
 0x182   : > { %1935 = vmatprep.subr.bf16.mxu1 %v2099_v29 }
 0x185   : > { %1936 = vmatpush3.bf16.msra.mxu1 %v2099_v29 }
 0x23b   : > { %v1899_v52 = vpop.f32.mrb[0].mxu1 }
 0x23c   : > { %v681_v53 = vadd.f32 %v1899_v52, %v1715_v51  ;;  %v672_v54 = vpop.f32.mrb[1].mxu1 }
 0x23d   : > { %v673_v55 = vadd.f32 %v1715_v51, %v672_v54  ;;  %v1900_v56 = vpop.f32.mrb[2].mxu1 }
 0x23e   : > { %v689_v57 = vsub.f32 0.0, %v681_v53  ;;  %v684_v58 = vadd.f32 %v1900_v56, %v1715_v51  ;;  %v675_v59 = vpop.f32.mrb[3].mxu1 }
 0x23f   : > { %v687_v60 = vsub.f32 0.0, %v673_v55  ;;  %v676_v61 = vadd.f32 %v1715_v51, %v675_v59 }
 0x240   : > { %v695_v62 = vmul.f32 1.442695, %v689_v57  ;;  %v690_v63 = vsub.f32 0.0, %v684_v58 }
 0x241   : > { %v691_v0 = vmul.f32 1.442695, %v687_v60  ;;  %v688_v1 = vsub.f32 0.0, %v676_v61 }
 0x242   : > { %2140 = vpow2.f32 %v695_v62  ;;  %v697_v2 = vmul.f32 1.442695, %v690_v63 }
 0x243   : > { %2142 = vpow2.f32 %v691_v0  ;;  %v693_v3 = vmul.f32 1.442695, %v688_v1 }
 0x244   : > { %2144 = vpow2.f32 %v697_v2 }
 0x245   : > { %2146 = vpow2.f32 %v693_v3 }
 0x24c   : > { %v2141_v4 = vpop.eup %2140 }
 0x24d   : > { %v2143_v5 = vpop.eup %2142  ;;  %v701_v6 = vadd.f32 1.0, %v2141_v4 }
 0x24e   : > { %v2145_v7 = vpop.eup %2144  ;;  %v699_v8 = vadd.f32 1.0, %v2143_v5  ;;  %v2100_v5 = vld [vmem:[%s2729_s3 + $0x40] sm:$0xff]  }
 0x24f   : > { %v2147_v9 = vpop.eup %2146  ;;  %2148 = vrcp.f32 %v701_v6  ;;  %v702_v10 = vadd.f32 1.0, %v2145_v7  ;;  %1941 = vmatprep.subr.bf16.mxu0 %v2100_v5  ;;  %v2101_v6 = vld [vmem:[%s2729_s3 + $0x48] sm:$0xff]   ;;  %v2102_v7 = vld [vmem:[%s2729_s3 + $0x50] sm:$0xff]  }
 0x250   : > { %2150 = vrcp.f32 %v699_v8  ;;  %v700_v11 = vadd.f32 1.0, %v2147_v9  ;;  %v2103_v8 = vld [vmem:[%s2729_s3 + $0x58] sm:$0xff]   ;;  %v2104_v9 = vld [vmem:[%s2729_s3 + $0x60] sm:$0xff]  }
 0x251   : > { %2152 = vrcp.f32 %v702_v10  ;;  %v2105_v10 = vld [vmem:[%s2729_s3 + $0x68] sm:$0xff]  }
 0x252   : > { %2154 = vrcp.f32 %v700_v11  ;;  %v2106_v11 = vld [vmem:[%s2729_s3 + $0x70] sm:$0xff]  }
 0x259   : > { %v2149_v12 = vpop.eup %2148 }
 0x25a   : > { %v2151_v13 = vpop.eup %2150  ;;  %v709_v16 = vmul.f32 %v2149_v12, %v681_v53  ;;  %v2107_v12 = vld [vmem:[%s2729_s3 + $0x78] sm:$0xff]  }
 0x25b   : > { %v2153_v14 = vpop.eup %2152  ;;  %v707_v18 = vmul.f32 %v2151_v13, %v673_v55  ;;  %v1733_v13 = vld [vmem:[%s2734_s8] ss:$0 sm:$0xff] }
 0x25c   : > { %v2155_v15 = vpop.eup %2154  ;;  %v710_v17 = vmul.f32 %v2153_v14, %v684_v58 }
 0x25d   : > { %v708_v19 = vmul.f32 %v2155_v15, %v676_v61 }
 0x25e   : > { %v712_v20 = vpack.c.bf16 %v710_v17, %v709_v16 }
 0x25f   : > { %v711_v21 = vpack.c.bf16 %v708_v19, %v707_v18 }
 0x261   : > { %1917 = vmatprep.mubr.bf16.mxu0 %v711_v21 }
 0x262   : > { %1918 = vmatmul.mubr.bf16.vlgmr.msra.gmra.mrb[4].mxu0 %v712_v20 }
 0x263   : > { %1942 = vmatpush3.bf16.msra.mxu0 %v2100_v5 }
 0x264   : > { %1943 = vmatprep.subr.bf16.mxu0 %v2101_v6 }
 0x267   : > { %1944 = vmatpush3.bf16.msra.mxu0 %v2101_v6 }
 0x268   : > { %1945 = vmatprep.subr.bf16.mxu0 %v2102_v7 }
 0x26b   : > { %1946 = vmatpush3.bf16.msra.mxu0 %v2102_v7 }
 0x26c   : > { %1947 = vmatprep.subr.bf16.mxu0 %v2103_v8 }
 0x26f   : > { %1948 = vmatpush3.bf16.msra.mxu0 %v2103_v8 }
 0x270   : > { %1949 = vmatprep.subr.bf16.mxu0 %v2104_v9 }
 0x273   : > { %1950 = vmatpush3.bf16.msra.mxu0 %v2104_v9 }
 0x274   : > { %1951 = vmatprep.subr.bf16.mxu0 %v2105_v10 }
 0x277   : > { %1952 = vmatpush3.bf16.msra.mxu0 %v2105_v10 }
 0x278   : > { %1953 = vmatprep.subr.bf16.mxu0 %v2106_v11 }
 0x27b   : > { %1954 = vmatpush3.bf16.msra.mxu0 %v2106_v11 }
 0x27c   : > { %1955 = vmatprep.subr.bf16.mxu0 %v2107_v12 }
 0x27f   : > { %1956 = vmatpush3.bf16.msra.mxu0 %v2107_v12 }
 0x335   : > { %v1919_v31 = vpop.f32.mrb[4].mxu0 }
 0x336   : > { %v827_v32 = vadd.f32 %v1919_v31, %v1724_v30  ;;  %v818_v33 = vpop.f32.mrb[5].mxu0 }
 0x337   : > { %v819_v34 = vadd.f32 %v1724_v30, %v818_v33  ;;  %v1920_v35 = vpop.f32.mrb[6].mxu0 }
 0x338   : > { %v835_v36 = vsub.f32 0.0, %v827_v32  ;;  %v830_v41 = vadd.f32 %v1920_v35, %v1724_v30  ;;  %v821_v42 = vpop.f32.mrb[7].mxu0 }
 0x339   : > { %v833_v43 = vsub.f32 0.0, %v819_v34  ;;  %v822_v44 = vadd.f32 %v1724_v30, %v821_v42 }
 0x33a   : > { %v841_v45 = vmul.f32 1.442695, %v835_v36  ;;  %v836_v46 = vsub.f32 0.0, %v830_v41 }
 0x33b   : > { %v837_v47 = vmul.f32 1.442695, %v833_v43  ;;  %v834_v48 = vsub.f32 0.0, %v822_v44 }
 0x33c   : > { %2156 = vpow2.f32 %v841_v45  ;;  %v843_v49 = vmul.f32 1.442695, %v836_v46 }
 0x33d   : > { %2158 = vpow2.f32 %v837_v47  ;;  %v839_v50 = vmul.f32 1.442695, %v834_v48  ;;  %v1003_v47 = vmul.f32 0.5, %v2622_v39 }
 0x33e   : > { %2160 = vpow2.f32 %v843_v49 }
 0x33f   : > { %2162 = vpow2.f32 %v839_v50  ;;  %v1006_v50 = vmul.f32 0.5, %v2620_v38  ;;  %v2108_v38 = vld [vmem:[#allocation6 + $0x40] sm:$0xff]  }
 0x340   : > { %1961 = vmatprep.subr.bf16.mxu1 %v2108_v38 }
 0x346   : > { %v2157_v51 = vpop.eup %2156 }
 0x347   : > { %v2159_v52 = vpop.eup %2158  ;;  %v847_v53 = vadd.f32 1.0, %v2157_v51 }
 0x348   : > { %v2161_v54 = vpop.eup %2160  ;;  %v845_v55 = vadd.f32 1.0, %v2159_v52 }
 0x349   : > { %v2163_v56 = vpop.eup %2162  ;;  %2164 = vrcp.f32 %v847_v53  ;;  %v848_v57 = vadd.f32 1.0, %v2161_v54  ;;  %v1004_v53 = vmul.f32 0.5, %v2624_v40  ;;  %v2110_v40 = vld [vmem:[#allocation6 + $0x50] sm:$0xff]  }
 0x34a   : > { %2166 = vrcp.f32 %v845_v55  ;;  %v846_v58 = vadd.f32 1.0, %v2163_v56 }
 0x34b   : > { %2168 = vrcp.f32 %v848_v57 }
 0x34c   : > { %2170 = vrcp.f32 %v846_v58  ;;  %v2109_v58 = vld [vmem:[#allocation6 + $0x48] sm:$0xff]  }
 0x353   : > { %v2165_v59 = vpop.eup %2164 }
 0x354   : > { %v2167_v60 = vpop.eup %2166  ;;  %v855_v63 = vmul.f32 %v2165_v59, %v827_v32  ;;  %v2111_v59 = vld [vmem:[#allocation6 + $0x58] sm:$0xff]  }
 0x355   : > { %v2169_v61 = vpop.eup %2168  ;;  %v853_v1 = vmul.f32 %v2167_v60, %v819_v34  ;;  %v2112_v60 = vld [vmem:[#allocation6 + $0x60] sm:$0xff]  }
 0x356   : > { %v2171_v62 = vpop.eup %2170  ;;  %v856_v0 = vmul.f32 %v2169_v61, %v830_v41  ;;  %v2113_v61 = vld [vmem:[#allocation6 + $0x68] sm:$0xff]  }
 0x357   : > { %v854_v2 = vmul.f32 %v2171_v62, %v822_v44  ;;  %v1005_v44 = vmul.f32 0.5, %v2618_v37  ;;  %v2114_v62 = vld [vmem:[#allocation6 + $0x70] sm:$0xff]  }
 0x358   : > { %v858_v3 = vpack.c.bf16 %v856_v0, %v855_v63  ;;  %v2115_v63 = vld [vmem:[#allocation6 + $0x78] sm:$0xff]   ;;  %v1759_v0 = vld [vmem:[%s2730_s4 + $0x1] ss:$0 sm:$0xff] }
 0x359   : > { %v857_v4 = vpack.c.bf16 %v854_v2, %v853_v1 }
 0x35b   : > { %1937 = vmatprep.mubr.bf16.mxu1 %v857_v4 }
 0x35c   : > { %1938 = vmatmul.mubr.bf16.vlgmr.msra.gmra.mrb[4].mxu1 %v858_v3 }
 0x35d   : > { %1962 = vmatpush3.bf16.msra.mxu1 %v2108_v38 }
 0x35e   : > { %1963 = vmatprep.subr.bf16.mxu1 %v2109_v58 }
 0x361   : > { %1964 = vmatpush3.bf16.msra.mxu1 %v2109_v58 }
 0x362   : > { %1965 = vmatprep.subr.bf16.mxu1 %v2110_v40 }
 0x365   : > { %1966 = vmatpush3.bf16.msra.mxu1 %v2110_v40 }
 0x366   : > { %1967 = vmatprep.subr.bf16.mxu1 %v2111_v59 }
 0x369   : > { %1968 = vmatpush3.bf16.msra.mxu1 %v2111_v59 }
 0x36a   : > { %1969 = vmatprep.subr.bf16.mxu1 %v2112_v60 }
 0x36d   : > { %1970 = vmatpush3.bf16.msra.mxu1 %v2112_v60 }
 0x36e   : > { %1971 = vmatprep.subr.bf16.mxu1 %v2113_v61 }
 0x371   : > { %1972 = vmatpush3.bf16.msra.mxu1 %v2113_v61 }
 0x372   : > { %1973 = vmatprep.subr.bf16.mxu1 %v2114_v62 }
 0x375   : > { %1974 = vmatpush3.bf16.msra.mxu1 %v2114_v62 }
 0x376   : > { %1975 = vmatprep.subr.bf16.mxu1 %v2115_v63 }
 0x379   : > { %1976 = vmatpush3.bf16.msra.mxu1 %v2115_v63 }
 0x42f   : > { %v1939_v14 = vpop.f32.mrb[4].mxu1 }
 0x430   : > { %v973_v15 = vadd.f32 %v1939_v14, %v1733_v13  ;;  %v964_v16 = vpop.f32.mrb[5].mxu1 }
 0x431   : > { %v965_v17 = vadd.f32 %v1733_v13, %v964_v16  ;;  %v1940_v18 = vpop.f32.mrb[6].mxu1 }
 0x432   : > { %v981_v19 = vsub.f32 0.0, %v973_v15  ;;  %v976_v20 = vadd.f32 %v1940_v18, %v1733_v13  ;;  %v967_v21 = vpop.f32.mrb[7].mxu1 }
 0x433   : > { %v979_v22 = vsub.f32 0.0, %v965_v17  ;;  %v968_v23 = vadd.f32 %v1733_v13, %v967_v21 }
 0x434   : > { %v987_v24 = vmul.f32 1.442695, %v981_v19  ;;  %v982_v25 = vsub.f32 0.0, %v976_v20 }
 0x435   : > { %v983_v26 = vmul.f32 1.442695, %v979_v22  ;;  %v980_v27 = vsub.f32 0.0, %v968_v23 }
 0x436   : > { %2172 = vpow2.f32 %v987_v24  ;;  %v989_v28 = vmul.f32 1.442695, %v982_v25 }
 0x437   : > { %2174 = vpow2.f32 %v983_v26  ;;  %v985_v29 = vmul.f32 1.442695, %v980_v27 }
 0x438   : > { %2176 = vpow2.f32 %v989_v28 }
 0x439   : > { %2178 = vpow2.f32 %v985_v29 }
 0x440   : > { %v2173_v30 = vpop.eup %2172 }
 0x441   : > { %v2175_v31 = vpop.eup %2174  ;;  %v993_v32 = vadd.f32 1.0, %v2173_v30 }
 0x442   : > { %v2177_v33 = vpop.eup %2176  ;;  %v991_v34 = vadd.f32 1.0, %v2175_v31 }
 0x443   : > { %v2179_v35 = vpop.eup %2178  ;;  %2180 = vrcp.f32 %v993_v32  ;;  %v994_v36 = vadd.f32 1.0, %v2177_v33 }
 0x444   : > { %2182 = vrcp.f32 %v991_v34  ;;  %v992_v41 = vadd.f32 1.0, %v2179_v35  ;;  %v2116_v35 = vld [vmem:[#allocation7 + $0x40] sm:$0xff]  }
 0x445   : > { %2184 = vrcp.f32 %v994_v36  ;;  %1981 = vmatprep.subr.bf16.mxu0 %v2116_v35  ;;  %v2117_v36 = vld [vmem:[#allocation7 + $0x48] sm:$0xff]  }
 0x446   : > { %2186 = vrcp.f32 %v992_v41  ;;  %v2118_v41 = vld [vmem:[#allocation7 + $0x50] sm:$0xff]  }
 0x44d   : > { %v2181_v42 = vpop.eup %2180 }
 0x44e   : > { %v2183_v43 = vpop.eup %2182  ;;  %v1001_v45 = vmul.f32 %v2181_v42, %v973_v15  ;;  %v2119_v42 = vld [vmem:[#allocation7 + $0x58] sm:$0xff]  }
 0x44f   : > { %v2185_v46 = vpop.eup %2184  ;;  %v999_v48 = vmul.f32 %v2183_v43, %v965_v17  ;;  %v2120_v43 = vld [vmem:[#allocation7 + $0x60] sm:$0xff]  }
 0x450   : > { %v2187_v49 = vpop.eup %2186  ;;  %v2666_v51 = vadd.f32 %v1005_v44, %v1001_v45  ;;  %v1002_v52 = vmul.f32 %v2185_v46, %v976_v20  ;;  %v2121_v44 = vld [vmem:[#allocation7 + $0x68] sm:$0xff]   ;;  %v2122_v45 = vld [vmem:[#allocation7 + $0x70] sm:$0xff]   ;;  %v2123_v46 = vld [vmem:[#allocation7 + $0x78] sm:$0xff]  }
 0x451   : > { %v2669_v54 = vadd.f32 %v1003_v47, %v999_v48  ;;  %v1000_v55 = vmul.f32 %v2187_v49, %v968_v23  ;;  %v1769_v47 = vld [vmem:[%s2732_s6 + $0x1] ss:$0 sm:$0xff] }
 0x452   : > { %v2671_v56 = vadd.f32 %v1006_v50, %v1002_v52 }
 0x453   : > { %v2673_v57 = vadd.f32 %v1004_v53, %v1000_v55 }
 0x454   : > { %v1012_v37 = vpack.c.bf16 %v2671_v56, %v2666_v51 }
 0x455   : > { %v1011_v39 = vpack.c.bf16 %v2673_v57, %v2669_v54 }
 0x457   : > { %1957 = vmatprep.mubr.bf16.mxu0 %v1011_v39 }
 0x458   : > { %1958 = vmatmul.mubr.bf16.vlgmr.msra.gmra.mrb[8].mxu0 %v1012_v37 }
 0x459   : > { %1982 = vmatpush3.bf16.msra.mxu0 %v2116_v35 }
 0x45a   : > { %1983 = vmatprep.subr.bf16.mxu0 %v2117_v36 }
 0x45d   : > { %1984 = vmatpush3.bf16.msra.mxu0 %v2117_v36 }
 0x45e   : > { %1985 = vmatprep.subr.bf16.mxu0 %v2118_v41 }
 0x461   : > { %1986 = vmatpush3.bf16.msra.mxu0 %v2118_v41 }
 0x462   : > { %1987 = vmatprep.subr.bf16.mxu0 %v2119_v42 }
 0x465   : > { %1988 = vmatpush3.bf16.msra.mxu0 %v2119_v42 }
 0x466   : > { %1989 = vmatprep.subr.bf16.mxu0 %v2120_v43 }
 0x469   : > { %1990 = vmatpush3.bf16.msra.mxu0 %v2120_v43 }
 0x46a   : > { %1991 = vmatprep.subr.bf16.mxu0 %v2121_v44 }
 0x46d   : > { %1992 = vmatpush3.bf16.msra.mxu0 %v2121_v44 }
 0x46e   : > { %1993 = vmatprep.subr.bf16.mxu0 %v2122_v45 }
 0x471   : > { %1994 = vmatpush3.bf16.msra.mxu0 %v2122_v45 }
 0x472   : > { %1995 = vmatprep.subr.bf16.mxu0 %v2123_v46 }
 0x475   : > { %1996 = vmatpush3.bf16.msra.mxu0 %v2123_v46 }
 0x52b   : > { %v1959_v1 = vpop.f32.mrb[8].mxu0 }
 0x52c   : > { %v1129_v2 = vadd.f32 %v1959_v1, %v1759_v0  ;;  %v1120_v3 = vpop.f32.mrb[9].mxu0 }
 0x52d   : > { %v1121_v4 = vadd.f32 %v1759_v0, %v1120_v3  ;;  %v1960_v5 = vpop.f32.mrb[10].mxu0 }
 0x52e   : > { %v1137_v6 = vsub.f32 0.0, %v1129_v2  ;;  %v1132_v7 = vadd.f32 %v1960_v5, %v1759_v0  ;;  %v1123_v8 = vpop.f32.mrb[11].mxu0 }
 0x52f   : > { %v1135_v9 = vsub.f32 0.0, %v1121_v4  ;;  %v1124_v10 = vadd.f32 %v1759_v0, %v1123_v8 }
 0x530   : > { %v1143_v11 = vmul.f32 1.442695, %v1137_v6  ;;  %v1138_v12 = vsub.f32 0.0, %v1132_v7 }
 0x531   : > { %v1139_v13 = vmul.f32 1.442695, %v1135_v9  ;;  %v1136_v14 = vsub.f32 0.0, %v1124_v10 }
 0x532   : > { %2188 = vpow2.f32 %v1143_v11  ;;  %v1145_v15 = vmul.f32 1.442695, %v1138_v12 }
 0x533   : > { %2190 = vpow2.f32 %v1139_v13  ;;  %v1141_v16 = vmul.f32 1.442695, %v1136_v14 }
 0x534   : > { %2192 = vpow2.f32 %v1145_v15 }
 0x535   : > { %2194 = vpow2.f32 %v1141_v16 }
 0x53c   : > { %v2189_v17 = vpop.eup %2188 }
 0x53d   : > { %v2191_v18 = vpop.eup %2190  ;;  %v1149_v19 = vadd.f32 1.0, %v2189_v17 }
 0x53e   : > { %v2193_v20 = vpop.eup %2192  ;;  %v1147_v21 = vadd.f32 1.0, %v2191_v18  ;;  %v2124_v18 = vld [vmem:[%s2735_s9] sm:$0xff]  }
 0x53f   : > { %v2195_v22 = vpop.eup %2194  ;;  %2196 = vrcp.f32 %v1149_v19  ;;  %v1150_v23 = vadd.f32 1.0, %v2193_v20  ;;  %2001 = vmatprep.subr.bf16.mxu1 %v2124_v18  ;;  %v2125_v19 = vld [vmem:[%s2735_s9 + $0x8] sm:$0xff]   ;;  %v2126_v20 = vld [vmem:[%s2735_s9 + $0x10] sm:$0xff]  }
 0x540   : > { %2198 = vrcp.f32 %v1147_v21  ;;  %v1148_v24 = vadd.f32 1.0, %v2195_v22  ;;  %v2127_v21 = vld [vmem:[%s2735_s9 + $0x18] sm:$0xff]   ;;  %v2128_v22 = vld [vmem:[%s2735_s9 + $0x20] sm:$0xff]  }
 0x541   : > { %2200 = vrcp.f32 %v1150_v23  ;;  %v2129_v23 = vld [vmem:[%s2735_s9 + $0x28] sm:$0xff]  }
 0x542   : > { %2202 = vrcp.f32 %v1148_v24  ;;  %v2130_v24 = vld [vmem:[%s2735_s9 + $0x30] sm:$0xff]  }
 0x549   : > { %v2197_v25 = vpop.eup %2196 }
 0x54a   : > { %v2199_v26 = vpop.eup %2198  ;;  %v1157_v29 = vmul.f32 %v2197_v25, %v1129_v2  ;;  %v2131_v25 = vld [vmem:[%s2735_s9 + $0x38] sm:$0xff]  }
 0x54b   : > { %v2201_v27 = vpop.eup %2200  ;;  %v1155_v31 = vmul.f32 %v2199_v26, %v1121_v4  ;;  %v1779_v26 = vld [vmem:[%s2734_s8 + $0x1] ss:$0 sm:$0xff] }
 0x54c   : > { %v2203_v28 = vpop.eup %2202  ;;  %v1158_v30 = vmul.f32 %v2201_v27, %v1132_v7 }
 0x54d   : > { %v1156_v32 = vmul.f32 %v2203_v28, %v1124_v10 }
 0x54e   : > { %v1160_v33 = vpack.c.bf16 %v1158_v30, %v1157_v29 }
 0x54f   : > { %v1159_v34 = vpack.c.bf16 %v1156_v32, %v1155_v31 }
 0x551   : > { %1977 = vmatprep.mubr.bf16.mxu1 %v1159_v34 }
 0x552   : > { %1978 = vmatmul.mubr.bf16.vlgmr.msra.gmra.mrb[8].mxu1 %v1160_v33 }
 0x553   : > { %2002 = vmatpush3.bf16.msra.mxu1 %v2124_v18 }
 0x554   : > { %2003 = vmatprep.subr.bf16.mxu1 %v2125_v19 }
 0x557   : > { %2004 = vmatpush3.bf16.msra.mxu1 %v2125_v19 }
 0x558   : > { %2005 = vmatprep.subr.bf16.mxu1 %v2126_v20 }
 0x55b   : > { %2006 = vmatpush3.bf16.msra.mxu1 %v2126_v20 }
 0x55c   : > { %2007 = vmatprep.subr.bf16.mxu1 %v2127_v21 }
 0x55f   : > { %2008 = vmatpush3.bf16.msra.mxu1 %v2127_v21 }
 0x560   : > { %2009 = vmatprep.subr.bf16.mxu1 %v2128_v22 }
 0x563   : > { %2010 = vmatpush3.bf16.msra.mxu1 %v2128_v22 }
 0x564   : > { %2011 = vmatprep.subr.bf16.mxu1 %v2129_v23 }
 0x567   : > { %2012 = vmatpush3.bf16.msra.mxu1 %v2129_v23 }
 0x568   : > { %2013 = vmatprep.subr.bf16.mxu1 %v2130_v24 }
 0x56b   : > { %2014 = vmatpush3.bf16.msra.mxu1 %v2130_v24 }
 0x56c   : > { %2015 = vmatprep.subr.bf16.mxu1 %v2131_v25 }
 0x56f   : > { %2016 = vmatpush3.bf16.msra.mxu1 %v2131_v25 }
 0x625   : > { %v1979_v48 = vpop.f32.mrb[8].mxu1 }
 0x626   : > { %v1277_v49 = vadd.f32 %v1979_v48, %v1769_v47  ;;  %v1268_v50 = vpop.f32.mrb[9].mxu1 }
 0x627   : > { %v1269_v52 = vadd.f32 %v1769_v47, %v1268_v50  ;;  %v1980_v53 = vpop.f32.mrb[10].mxu1 }
 0x628   : > { %v1285_v55 = vsub.f32 0.0, %v1277_v49  ;;  %v1280_v37 = vadd.f32 %v1980_v53, %v1769_v47  ;;  %v1271_v39 = vpop.f32.mrb[11].mxu1 }
 0x629   : > { %v1283_v38 = vsub.f32 0.0, %v1269_v52  ;;  %v1272_v58 = vadd.f32 %v1769_v47, %v1271_v39 }
 0x62a   : > { %v1291_v40 = vmul.f32 1.442695, %v1285_v55  ;;  %v1286_v59 = vsub.f32 0.0, %v1280_v37 }
 0x62b   : > { %v1287_v60 = vmul.f32 1.442695, %v1283_v38  ;;  %v1284_v61 = vsub.f32 0.0, %v1272_v58 }
 0x62c   : > { %2204 = vpow2.f32 %v1291_v40  ;;  %v1293_v62 = vmul.f32 1.442695, %v1286_v59  ;;  %v1457_v40 = vmul.f32 0.5, %v2666_v51  ;;  %v1788_v51 = vld [vmem:[%s2736_s10] ss:$0 sm:$0xff] }
 0x62d   : > { %2206 = vpow2.f32 %v1287_v60  ;;  %v1289_v63 = vmul.f32 1.442695, %v1284_v61  ;;  %v1455_v61 = vmul.f32 0.5, %v2669_v54 }
 0x62e   : > { %2208 = vpow2.f32 %v1293_v62 }
 0x62f   : > { %2210 = vpow2.f32 %v1289_v63 }
 0x636   : > { %v2205_v0 = vpop.eup %2204 }
 0x637   : > { %v2207_v1 = vpop.eup %2206  ;;  %v1297_v2 = vadd.f32 1.0, %v2205_v0 }
 0x638   : > { %v2209_v3 = vpop.eup %2208  ;;  %v1295_v4 = vadd.f32 1.0, %v2207_v1  ;;  %v1458_v1 = vmul.f32 0.5, %v2671_v56 }
 0x639   : > { %v2211_v5 = vpop.eup %2210  ;;  %2212 = vrcp.f32 %v1297_v2  ;;  %v1298_v6 = vadd.f32 1.0, %v2209_v3 }
 0x63a   : > { %2214 = vrcp.f32 %v1295_v4  ;;  %v1296_v7 = vadd.f32 1.0, %v2211_v5  ;;  %v1456_v4 = vmul.f32 0.5, %v2673_v57 }
 0x63b   : > { %2216 = vrcp.f32 %v1298_v6 }
 0x63c   : > { %2218 = vrcp.f32 %v1296_v7 }
 0x643   : > { %v2213_v8 = vpop.eup %2212 }
 0x644   : > { %v2215_v9 = vpop.eup %2214  ;;  %v1305_v12 = vmul.f32 %v2213_v8, %v1277_v49 }
 0x645   : > { %v2217_v10 = vpop.eup %2216  ;;  %v1303_v14 = vmul.f32 %v2215_v9, %v1269_v52 }
 0x646   : > { %v2219_v11 = vpop.eup %2218  ;;  %v1306_v13 = vmul.f32 %v2217_v10, %v1280_v37 }
 0x647   : > { %v1304_v15 = vmul.f32 %v2219_v11, %v1272_v58 }
 0x648   : > { %v1308_v16 = vpack.c.bf16 %v1306_v13, %v1305_v12 }
 0x649   : > { %v1307_v17 = vpack.c.bf16 %v1304_v15, %v1303_v14 }
 0x64b   : > { %1997 = vmatprep.mubr.bf16.mxu0 %v1307_v17 }
 0x64c   : > { %1998 = vmatmul.mubr.bf16.vlgmr.msra.gmra.mrb[12].mxu0 %v1308_v16 }
 0x71f   : > { %v1999_v27 = vpop.f32.mrb[12].mxu0 }
 0x720   : > { %v1425_v28 = vadd.f32 %v1999_v27, %v1779_v26  ;;  %v1416_v29 = vpop.f32.mrb[13].mxu0 }
 0x721   : > { %v1417_v30 = vadd.f32 %v1779_v26, %v1416_v29  ;;  %v2000_v31 = vpop.f32.mrb[14].mxu0 }
 0x722   : > { %v1433_v32 = vsub.f32 0.0, %v1425_v28  ;;  %v1428_v33 = vadd.f32 %v2000_v31, %v1779_v26  ;;  %v1419_v34 = vpop.f32.mrb[15].mxu0 }
 0x723   : > { %v1431_v35 = vsub.f32 0.0, %v1417_v30  ;;  %v1420_v36 = vadd.f32 %v1779_v26, %v1419_v34 }
 0x724   : > { %v1439_v41 = vmul.f32 1.442695, %v1433_v32  ;;  %v1434_v42 = vsub.f32 0.0, %v1428_v33 }
 0x725   : > { %v1435_v43 = vmul.f32 1.442695, %v1431_v35  ;;  %v1432_v44 = vsub.f32 0.0, %v1420_v36 }
 0x726   : > { %2220 = vpow2.f32 %v1439_v41  ;;  %v1441_v45 = vmul.f32 1.442695, %v1434_v42 }
 0x727   : > { %2222 = vpow2.f32 %v1435_v43  ;;  %v1437_v46 = vmul.f32 1.442695, %v1432_v44 }
 0x728   : > { %2224 = vpow2.f32 %v1441_v45 }
 0x729   : > { %2226 = vpow2.f32 %v1437_v46 }
 0x730   : > { %v2221_v47 = vpop.eup %2220 }
 0x731   : > { %v2223_v48 = vpop.eup %2222  ;;  %v1445_v49 = vadd.f32 1.0, %v2221_v47 }
 0x732   : > { %v2225_v50 = vpop.eup %2224  ;;  %v1443_v52 = vadd.f32 1.0, %v2223_v48 }
 0x733   : > { %v2227_v53 = vpop.eup %2226  ;;  %2228 = vrcp.f32 %v1445_v49  ;;  %v1446_v55 = vadd.f32 1.0, %v2225_v50 }
 0x734   : > { %2230 = vrcp.f32 %v1443_v52  ;;  %v1444_v37 = vadd.f32 1.0, %v2227_v53 }
 0x735   : > { %2232 = vrcp.f32 %v1446_v55 }
 0x736   : > { %2234 = vrcp.f32 %v1444_v37 }
 0x73d   : > { %v2229_v39 = vpop.eup %2228 }
 0x73e   : > { %v2231_v38 = vpop.eup %2230  ;;  %v1453_v58 = vmul.f32 %v2229_v39, %v1425_v28 }
 0x73f   : > { %v2233_v59 = vpop.eup %2232  ;;  %v1451_v60 = vmul.f32 %v2231_v38, %v1417_v30 }
 0x740   : > { %v2235_v62 = vpop.eup %2234  ;;  %v1461_v63 = vadd.f32 %v1457_v40, %v1453_v58  ;;  %v1454_v0 = vmul.f32 %v2233_v59, %v1428_v33 }
 0x741   : > { %v1459_v2 = vadd.f32 %v1455_v61, %v1451_v60  ;;  %v1452_v3 = vmul.f32 %v2235_v62, %v1420_v36 }
 0x742   : > { %v1462_v5 = vadd.f32 %v1458_v1, %v1454_v0 }
 0x743   : > { %v1460_v6 = vadd.f32 %v1456_v4, %v1452_v3 }
 0x744   : > { %v1464_v7 = vpack.c.bf16 %v1462_v5, %v1461_v63 }
 0x745   : > { %v1463_v8 = vpack.c.bf16 %v1460_v6, %v1459_v2 }
 0x747   : > { %2017 = vmatprep.mubr.bf16.mxu1 %v1463_v8 }
 0x748   : > { %2018 = vmatmul.mubr.bf16.vlgmr.msra.gmra.mrb[12].mxu1 %v1464_v7 }
 0x81b   : > { %v2019_v54 = vpop.f32.mrb[12].mxu1 }
 0x81c   : > { %v1570_v56 = vpop.f32.mrb[13].mxu1  ;;  %v1579_v12 = vadd.f32 %v2019_v54, %v1788_v51 }
 0x81d   : > { %v1571_v9 = vadd.f32 %v1788_v51, %v1570_v56  ;;  %v2020_v57 = vpop.f32.mrb[14].mxu1 }
 0x81e   : > { %v1573_v10 = vpop.f32.mrb[15].mxu1  ;;  %v1582_v13 = vadd.f32 %v2020_v57, %v1788_v51  ;;  %1588 = vst.msk [vmem:[%s445_s16 + $0x10] sm:$0xff] %vm1585_vm5, %v1579_v12 }
 0x81f   : > { %1586 = vst.msk [vmem:[%s445_s16] sm:$0xff] %vm1585_vm5, %v1571_v9  ;;  %v1574_v11 = vadd.f32 %v1788_v51, %v1573_v10 }
 0x820   : > { %1589 = vst.msk [vmem:[%s445_s16 + $0x18] sm:$0xff] %vm1585_vm5, %v1582_v13 }
 0x821   : > { %1587 = vst.msk [vmem:[%s445_s16 + $0x8] sm:$0xff] %vm1585_vm5, %v1574_v11 }
 0x822 PF: > { %s24_s17 = sadd.s32 1, %s2366_s17  }
 0x823   : > { %p21_p3 = scmp.ge.s32.totalorder %s24_s17, 4  }
 0x825   :  { %23 = sbr.rel (!%p21_p3) target bundleno = 3 (0x3), region = 117 }
 0x82c   :  { %1612 = vsyncpa [#allocation3], 1 }
 0x82d   :  { %1614 = vsyncpa [#allocation3 + $0x1], 1 }
 0x82e   :  { %1615 = vsyncpa [#allocation5], 1 }
 0x82f   :  { %1616 = vsyncpa [#allocation8], 1 }

</bundles_post_ra>
